<compile_context>
chip_gen: v7x
topology: tpu7x:2x2x1
jax: 0.10.0
libtpu: 0.0.40
codegen_flags: <defaults>
</compile_context>

<pallas_src>
import functools

import jax
import jax.numpy as jnp
from jax.experimental import pallas as pl
from jax.experimental.pallas import tpu as pltpu


# ---------------------------------------------------------------------------
# Kernels
# ---------------------------------------------------------------------------

def _linear_kernel(x_ref, w_ref, b_ref, o_ref):
    o_ref[...] = (
        jnp.dot(x_ref[...], w_ref[...], preferred_element_type=jnp.float32)
        + b_ref[...]
    ).astype(o_ref.dtype)


def _user_gate_kernel(user_ref, comb_ref,
                      uvw_ref, uvb_ref, w1u_ref,
                      gw1_ref, gb1_ref, gg_ref, gbe_ref, gw2_ref, gb2_ref,
                      uadd_ref, gate_ref, *, eps):
    # User value projection, folded straight into out_proj's first Linear:
    #   uadd = (user_emb @ Wv + bv) @ out_w1[dim:, :]
    uv = (jnp.dot(user_ref[...], uvw_ref[...], preferred_element_type=jnp.float32)
          + uvb_ref[...])
    uadd_ref[...] = jnp.dot(
        uv, w1u_ref[...], preferred_element_type=jnp.float32
    ).astype(uadd_ref.dtype)

    # Attention gate: Linear -> LayerNorm -> ReLU -> Linear -> Sigmoid.
    h = (jnp.dot(comb_ref[...], gw1_ref[...], preferred_element_type=jnp.float32)
         + gb1_ref[...])
    mu = jnp.mean(h, axis=-1, keepdims=True)
    var = jnp.mean(jnp.square(h - mu), axis=-1, keepdims=True)
    h = (h - mu) * jax.lax.rsqrt(var + eps) * gg_ref[...] + gbe_ref[...]
    h = jnp.maximum(h, 0.0)
    g = jnp.dot(h, gw2_ref[...], preferred_element_type=jnp.float32) + gb2_ref[...]
    gate_ref[...] = jax.nn.sigmoid(g).astype(gate_ref.dtype)


def _item_attn_kernel(aw_ref, mask_ref, q_ref, k_ref, v_ref, o_ref, *, num_heads):
    b = pl.program_id(0)
    h = pl.program_id(1)

    q = q_ref[0, 0]                      # (S, Dh), already scaled by 1/sqrt(Dh)
    k = k_ref[0, 0]
    v = v_ref[0, 0]
    keep = mask_ref[0] > 0.0             # (1, S) key-padding mask
    s_len = q.shape[0]

    # Signed-log relative-position bias, generated in-kernel (no (S,S) HBM input).
    ri = jax.lax.broadcasted_iota(jnp.int32, (s_len, s_len), 0)
    ci = jax.lax.broadcasted_iota(jnp.int32, (s_len, s_len), 1)
    pid = (ci - ri).astype(jnp.float32)
    sgn = jnp.where(pid > 0.0, 1.0, jnp.where(pid < 0.0, -1.0, 0.0))
    rel = sgn * jnp.log(1.0 + jnp.abs(pid))

    aw = aw_ref[b * num_heads + h]       # per-(batch, head) gate scalar from SMEM

    scores = jax.lax.dot_general(q, k, (((1,), (1,)), ((), ())),
                                 preferred_element_type=jnp.float32)
    scores = scores + aw * rel
    scores = jnp.where(keep, scores, jnp.float32(-1e9))

    m = jnp.max(scores, axis=-1, keepdims=True)
    e = jnp.exp(scores - m)
    p = e / jnp.sum(e, axis=-1, keepdims=True)
    # TODO(synk): attention-prob dropout is eval-mode identity here.

    o_ref[0, 0] = jnp.dot(p, v, preferred_element_type=jnp.float32).astype(o_ref.dtype)


def _out_proj_kernel(x_ref, uadd_ref, w1_ref, b1_ref, g_ref, be_ref,
                     w2_ref, b2_ref, o_ref, *, eps):
    # First Linear with the user-value contribution pre-folded (uadd).
    h = (jnp.dot(x_ref[0], w1_ref[...], preferred_element_type=jnp.float32)
         + uadd_ref[0] + b1_ref[...])
    mu = jnp.mean(h, axis=-1, keepdims=True)
    var = jnp.mean(jnp.square(h - mu), axis=-1, keepdims=True)
    h = (h - mu) * jax.lax.rsqrt(var + eps) * g_ref[...] + be_ref[...]
    h = jnp.maximum(h, 0.0)
    # TODO(synk): out_proj dropout between ReLU and the last Linear is eval-mode identity.
    o = jnp.dot(h, w2_ref[...], preferred_element_type=jnp.float32) + b2_ref[...]
    o_ref[0] = o.astype(o_ref.dtype)


# ---------------------------------------------------------------------------
# Pallas wrappers
# ---------------------------------------------------------------------------

def _row_tile(m, max_tile=512):
    # Largest row tile we are willing to hold in VMEM; small shapes use one block.
    return m if m <= max_tile else max_tile


def pallas_linear(x, w, b):
    m, kdim = x.shape
    n = w.shape[1]
    tm = _row_tile(m)
    return pl.pallas_call(
        _linear_kernel,
        out_shape=jax.ShapeDtypeStruct((m, n), x.dtype),
        grid=(pl.cdiv(m, tm),),
        in_specs=[
            pl.BlockSpec((tm, kdim), lambda i: (i, 0)),
            pl.BlockSpec((kdim, n), lambda i: (0, 0)),
            pl.BlockSpec((1, n), lambda i: (0, 0)),
        ],
        out_specs=pl.BlockSpec((tm, n), lambda i: (i, 0)),
        compiler_params=pltpu.CompilerParams(dimension_semantics=("parallel",)),
    )(x, w, b.reshape(1, n))


def pallas_user_gate(user_emb, combined, uvw, uvb, w1_user,
                     gw1, gb1, gg, gbe, gw2, gb2):
    bsz, udim = user_emb.shape
    cdim = combined.shape[1]
    dim = uvw.shape[1]
    two_dim = w1_user.shape[1]
    nheads = gw2.shape[1]

    def full(shape):
        return pl.BlockSpec(shape, lambda i, _s=shape: tuple(0 for _ in _s))

    kern = functools.partial(_user_gate_kernel, eps=1e-5)
    uadd, gate = pl.pallas_call(
        kern,
        out_shape=(jax.ShapeDtypeStruct((bsz, two_dim), jnp.float32),
                   jax.ShapeDtypeStruct((bsz, nheads), jnp.float32)),
        grid=(1,),
        in_specs=[
            full((bsz, udim)), full((bsz, cdim)),
            full((udim, dim)), full((1, dim)), full((dim, two_dim)),
            full((cdim, dim)), full((1, dim)), full((1, dim)), full((1, dim)),
            full((dim, nheads)), full((1, nheads)),
        ],
        out_specs=(full((bsz, two_dim)), full((bsz, nheads))),
    )(user_emb, combined,
      uvw, uvb.reshape(1, dim), w1_user,
      gw1, gb1.reshape(1, dim), gg.reshape(1, dim), gbe.reshape(1, dim),
      gw2, gb2.reshape(1, nheads))
    return uadd, gate


def pallas_item_attention(attn_w_flat, maskf, q, k, v, *, num_heads):
    B, H, S, Dh = q.shape
    kern = functools.partial(_item_attn_kernel, num_heads=num_heads)
    return pl.pallas_call(
        kern,
        out_shape=jax.ShapeDtypeStruct((B, H, S, Dh), q.dtype),
        grid=(B, H),
        in_specs=[
            pl.BlockSpec(memory_space=pltpu.MemorySpace.SMEM),        # (B*H,) gate
            pl.BlockSpec((1, 1, S), lambda b, h: (b, 0, 0)),          # key mask
            pl.BlockSpec((1, 1, S, Dh), lambda b, h: (b, h, 0, 0)),   # q
            pl.BlockSpec((1, 1, S, Dh), lambda b, h: (b, h, 0, 0)),   # k
            pl.BlockSpec((1, 1, S, Dh), lambda b, h: (b, h, 0, 0)),   # v
        ],
        out_specs=pl.BlockSpec((1, 1, S, Dh), lambda b, h: (b, h, 0, 0)),
        compiler_params=pltpu.CompilerParams(
            dimension_semantics=("parallel", "parallel")),
    )(attn_w_flat, maskf, q, k, v)


def pallas_out_proj(item_out, uadd, w1_item, b1, g, be, w2, b2):
    B, S, dim = item_out.shape
    two_dim = w1_item.shape[1]
    out_dim = w2.shape[1]
    ts = _row_tile(S)
    kern = functools.partial(_out_proj_kernel, eps=1e-5)
    return pl.pallas_call(
        kern,
        out_shape=jax.ShapeDtypeStruct((B, S, out_dim), item_out.dtype),
        grid=(B, pl.cdiv(S, ts)),
        in_specs=[
            pl.BlockSpec((1, ts, dim), lambda b, s: (b, s, 0)),
            pl.BlockSpec((1, 1, two_dim), lambda b, s: (b, 0, 0)),
            pl.BlockSpec((dim, two_dim), lambda b, s: (0, 0)),
            pl.BlockSpec((1, two_dim), lambda b, s: (0, 0)),
            pl.BlockSpec((1, two_dim), lambda b, s: (0, 0)),
            pl.BlockSpec((1, two_dim), lambda b, s: (0, 0)),
            pl.BlockSpec((two_dim, out_dim), lambda b, s: (0, 0)),
            pl.BlockSpec((1, out_dim), lambda b, s: (0, 0)),
        ],
        out_specs=pl.BlockSpec((1, ts, out_dim), lambda b, s: (b, s, 0)),
        compiler_params=pltpu.CompilerParams(
            dimension_semantics=("parallel", "parallel")),
    )(item_out, uadd.reshape(B, 1, two_dim),
      w1_item, b1.reshape(1, two_dim), g.reshape(1, two_dim),
      be.reshape(1, two_dim), w2, b2.reshape(1, out_dim))


# ---------------------------------------------------------------------------
# Full forward (mirrors AdaptiveUserAwareAttention.forward, eval mode)
# ---------------------------------------------------------------------------

def adaptive_user_aware_attention(params, x, user_emb, mask=None, *, num_heads):
    B, S, dim = x.shape
    head_dim = dim // num_heads
    scaling = float(head_dim) ** -0.5
    f32 = jnp.float32

    # Fused item QKV weights; 1/sqrt(head_dim) folded into the q columns.
    item_qkv_w = jnp.concatenate(
        [params['item_q_w'] * scaling, params['item_k_w'], params['item_v_w']],
        axis=1)
    item_qkv_b = jnp.concatenate(
        [params['item_q_b'] * scaling, params['item_k_b'], params['item_v_b']])

    item_qkv = pallas_linear(x.reshape(B * S, dim), item_qkv_w, item_qkv_b)

    # Head-major (B, H, S, Dh) so the attention kernel never lane-slices heads.
    qkv = item_qkv.reshape(B, S, 3, num_heads, head_dim).transpose(2, 0, 3, 1, 4)
    item_q, item_k, item_v = qkv[0], qkv[1], qkv[2]

    # Fused: user-V projection (folded into out_proj first Linear) + gate MLP.
    # NOTE: user_q / user_k are never needed — the user-attention softmax has
    # constant q/k over the sequence, so every probability row sums to 1 and
    # attn @ V collapses exactly to a broadcast of user_v.
    combined = jnp.concatenate([jnp.mean(x, axis=1), user_emb], axis=-1)
    uadd, attn_w = pallas_user_gate(
        user_emb, combined,
        params['user_v_w'], params['user_v_b'], params['out_w1'][dim:, :],
        params['gate_w1'], params['gate_b1'], params['gate_g'], params['gate_be'],
        params['gate_w2'], params['gate_b2'])

    if mask is None:
        maskf = jnp.ones((B, 1, S), dtype=f32)
    else:
        maskf = mask.astype(f32).reshape(B, 1, S)

    item_out = pallas_item_attention(
        attn_w.reshape(-1).astype(f32), maskf, item_q, item_k, item_v,
        num_heads=num_heads)                                   # (B, H, S, Dh)
    item_out = item_out.transpose(0, 2, 1, 3).reshape(B, S, dim)

    out = pallas_out_proj(item_out, uadd,
                          params['out_w1'][:dim, :], params['out_b1'],
                          params['out_g'], params['out_be'],
                          params['out_w2'], params['out_b2'])
    return out


# ---------------------------------------------------------------------------
# Pure-JAX reference (mirrors the PyTorch module op-for-op, eval mode)
# ---------------------------------------------------------------------------

def _layernorm_ref(x, g, b, eps=1e-5):
    mu = jnp.mean(x, axis=-1, keepdims=True)
    var = jnp.mean(jnp.square(x - mu), axis=-1, keepdims=True)
    return (x - mu) / jnp.sqrt(var + eps) * g + b


def reference_forward(p, x, user_emb, mask):
    hi = jax.lax.Precision.HIGHEST
    mm = lambda a, b: jnp.matmul(a, b, precision=hi)
    B, S, dim = x.shape
    H = p['gate_w2'].shape[1]
    Dh = dim // H
    scaling = float(Dh) ** -0.5

    uq = mm(user_emb, p['user_q_w']) + p['user_q_b']
    uk = mm(user_emb, p['user_k_w']) + p['user_k_b']
    uv = mm(user_emb, p['user_v_w']) + p['user_v_b']
    iq = mm(x, p['item_q_w']) + p['item_q_b']
    ik = mm(x, p['item_k_w']) + p['item_k_b']
    iv = mm(x, p['item_v_w']) + p['item_v_b']

    comb = jnp.concatenate([x.mean(axis=1), user_emb], axis=-1)
    g = _layernorm_ref(mm(comb, p['gate_w1']) + p['gate_b1'], p['gate_g'], p['gate_be'])
    g = jnp.maximum(g, 0.0)
    aw = jax.nn.sigmoid(mm(g, p['gate_w2']) + p['gate_b2'])

    def split_heads(t):
        return t.reshape(B, S, H, Dh).transpose(0, 2, 1, 3)

    q, k, v = split_heads(iq), split_heads(ik), split_heads(iv)
    uqe = split_heads(jnp.broadcast_to(uq[:, None, :], (B, S, dim)))
    uke = split_heads(jnp.broadcast_to(uk[:, None, :], (B, S, dim)))
    uve = split_heads(jnp.broadcast_to(uv[:, None, :], (B, S, dim)))

    item_s = jnp.einsum('bhqd,bhkd->bhqk', q, k, precision=hi) * scaling
    user_s = jnp.einsum('bhqd,bhkd->bhqk', uqe, uke, precision=hi) * scaling

    pos = jnp.arange(S, dtype=jnp.float32)
    pid = pos[None, :] - pos[:, None]
    bias = aw[:, :, None, None] * (jnp.sign(pid) * jnp.log1p(jnp.abs(pid)))[None, None]
    item_s = item_s + bias
    user_s = user_s + bias
    if mask is not None:
        m = mask[:, None, None, :]
        item_s = jnp.where(m, item_s, -1e9)
        user_s = jnp.where(m, user_s, -1e9)
    item_p = jax.nn.softmax(item_s, axis=-1)
    user_p = jax.nn.softmax(user_s, axis=-1)
    item_o = jnp.einsum('bhqk,bhkd->bhqd', item_p, v, precision=hi)
    user_o = jnp.einsum('bhqk,bhkd->bhqd', user_p, uve, precision=hi)
    item_o = item_o.transpose(0, 2, 1, 3).reshape(B, S, dim)
    user_o = user_o.transpose(0, 2, 1, 3).reshape(B, S, dim)
    co = jnp.concatenate([item_o, user_o], axis=-1)
    h = _layernorm_ref(mm(co, p['out_w1']) + p['out_b1'], p['out_g'], p['out_be'])
    h = jnp.maximum(h, 0.0)
    return mm(h, p['out_w2']) + p['out_b2']


# ---------------------------------------------------------------------------
# Setup + check
# ---------------------------------------------------------------------------

def init_params(key, dim, num_heads, user_dim):
    ks = jax.random.split(key, 24)
    w = lambda k, shape, s=0.1: (s * jax.random.normal(k, shape)).astype(jnp.float32)
    return dict(
        user_q_w=w(ks[0], (user_dim, dim)), user_q_b=w(ks[1], (dim,)),
        user_k_w=w(ks[2], (user_dim, dim)), user_k_b=w(ks[3], (dim,)),
        user_v_w=w(ks[4], (user_dim, dim)), user_v_b=w(ks[5], (dim,)),
        item_q_w=w(ks[6], (dim, dim)), item_q_b=w(ks[7], (dim,)),
        item_k_w=w(ks[8], (dim, dim)), item_k_b=w(ks[9], (dim,)),
        item_v_w=w(ks[10], (dim, dim)), item_v_b=w(ks[11], (dim,)),
        gate_w1=w(ks[12], (dim + user_dim, dim)), gate_b1=w(ks[13], (dim,)),
        gate_g=(1.0 + w(ks[14], (dim,))).astype(jnp.float32), gate_be=w(ks[15], (dim,)),
        gate_w2=w(ks[16], (dim, num_heads)), gate_b2=w(ks[17], (num_heads,)),
        out_w1=w(ks[18], (2 * dim, 2 * dim)), out_b1=w(ks[19], (2 * dim,)),
        out_g=(1.0 + w(ks[20], (2 * dim,))).astype(jnp.float32), out_be=w(ks[21], (2 * dim,)),
        out_w2=w(ks[22], (2 * dim, dim)), out_b2=w(ks[23], (dim,)),
    )


if __name__ == "__main__":
    B, S, DIM, HEADS, USER_DIM = 2, 8, 32, 4, 16

    key = jax.random.PRNGKey(0)
    kp, kx, ku = jax.random.split(key, 3)
    params = init_params(kp, DIM, HEADS, USER_DIM)
    x = jax.random.normal(kx, (B, S, DIM), dtype=jnp.float32)
    user_emb = jax.random.normal(ku, (B, USER_DIM), dtype=jnp.float32)
    # Key-padding mask: batch 0 fully valid, batch 1 has last two positions masked.
    mask = jnp.arange(S)[None, :] < jnp.array([S, S - 2])[:, None]     # (B, S) bool

    out = adaptive_user_aware_attention(params, x, user_emb, mask, num_heads=HEADS)
    out = jax.block_until_ready(out)

    ref = reference_forward(params, x, user_emb, mask)
    assert out.shape == (B, S, DIM) and out.dtype == x.dtype
    max_err = float(jnp.max(jnp.abs(out - ref)))
    assert jnp.allclose(out, ref, atol=2e-3, rtol=2e-3), \
        f"mismatch vs reference: max abs err {max_err}"

    print("KERNEL_OK")
</pallas_src>

<mosaic_0001>
module attributes {stable_mosaic.version = 11 : i64} {
  func.func @_linear_kernel(%arg0: i32, %arg1: memref<16x32xf32, #tpu.memory_space<vmem>>, %arg2: memref<32x96xf32, #tpu.memory_space<vmem>>, %arg3: memref<1x96xf32, #tpu.memory_space<vmem>>, %arg4: memref<16x96xf32, #tpu.memory_space<vmem>>) attributes {dimension_semantics = [#tpu.dimension_semantics<parallel>], iteration_bounds = array<i64: 1>, scalar_prefetch = 0 : i64, scratch_operands = 0 : i64, tpu.core_type = #tpu.core_type<tc>, window_params = [{transform_indices = @transform_0, window_bounds = array<i64: 16, 32>}, {pipeline_mode = #tpu.pipeline_mode<synchronous>, transform_indices = @transform_1, window_bounds = array<i64: 32, 96>}, {pipeline_mode = #tpu.pipeline_mode<synchronous>, transform_indices = @transform_2, window_bounds = array<i64: 1, 96>}, {transform_indices = @transform_3, window_bounds = array<i64: 16, 96>}]} {
    %c0 = arith.constant 0 : index
    %c0_0 = arith.constant 0 : index
    %0 = vector.load %arg1[%c0, %c0_0] : memref<16x32xf32, #tpu.memory_space<vmem>>, vector<16x32xf32>
    %c0_1 = arith.constant 0 : index
    %c0_2 = arith.constant 0 : index
    %1 = vector.load %arg2[%c0_1, %c0_2] : memref<32x96xf32, #tpu.memory_space<vmem>>, vector<32x96xf32>
    %cst = arith.constant dense<0.000000e+00> : vector<16x96xf32>
    %2 = tpu.matmul %0, %1, %cst {dimension_numbers = #tpu.dot_dimension_numbers<[1], [0], [0], [1], [0, 0, 1, 1], [], []>} : vector<16x32xf32>, vector<32x96xf32>, vector<16x96xf32> -> vector<16x96xf32>
    %c0_3 = arith.constant 0 : index
    %c0_4 = arith.constant 0 : index
    %3 = vector.load %arg3[%c0_3, %c0_4] : memref<1x96xf32, #tpu.memory_space<vmem>>, vector<1x96xf32>
    %4 = vector.broadcast %3 : vector<1x96xf32> to vector<16x96xf32>
    %5 = arith.addf %2, %4 : vector<16x96xf32>
    %c0_5 = arith.constant 0 : index
    %c0_6 = arith.constant 0 : index
    %6 = vector.load %arg4[%c0_5, %c0_6] : memref<16x96xf32, #tpu.memory_space<vmem>>, vector<16x96xf32>
    tpu.vector_store %arg4[%c0_5, %c0_6], %5 {strides = array<i32>} : memref<16x96xf32, #tpu.memory_space<vmem>>, vector<16x96xf32>,
    return
  }
  func.func @transform_0(%arg0: i32) -> (i32, i32) {
    %c0_i32 = arith.constant 0 : i32
    %c0_i32_0 = arith.constant 0 : i32
    return %arg0, %c0_i32 : i32, i32
  }
  func.func @transform_1(%arg0: i32) -> (i32, i32) {
    %c0_i32 = arith.constant 0 : i32
    %c0_i32_0 = arith.constant 0 : i32
    %c0_i32_1 = arith.constant 0 : i32
    return %c0_i32, %c0_i32_0 : i32, i32
  }
  func.func @transform_2(%arg0: i32) -> (i32, i32) {
    %c0_i32 = arith.constant 0 : i32
    %c0_i32_0 = arith.constant 0 : i32
    %c0_i32_1 = arith.constant 0 : i32
    return %c0_i32, %c0_i32_0 : i32, i32
  }
  func.func @transform_3(%arg0: i32) -> (i32, i32) {
    %c0_i32 = arith.constant 0 : i32
    %c0_i32_0 = arith.constant 0 : i32
    return %arg0, %c0_i32 : i32, i32
  }
}

</mosaic_0001>

<bundles_post_ra>
// kernel: tpu_custom_call.1
= control target key start
LH: loop header
LB: loop body
LE: loop exit
PB: predicated region body
PF: predicated region fallthrough
CT: control target
= control target key end

     0   :  { %8 = vsyncpa [#allocation3], 0  ;;  %s337_s0 = inlined_call_operand.hbm [shape: f32[16,32], index: 0, kind: input, shape index: {}]   ;;  %s338_s1 = inlined_call_operand.hbm [shape: f32[32,96], index: 1, kind: input, shape index: {}]   ;;  %s339_s2 = inlined_call_operand.vmem [shape: f32[1,96], index: 2, kind: input, shape index: {}]   ;;  %s340_s3 = inlined_call_operand.hbm [shape: f32[16,96], index: 3, kind: output, shape index: {}]  }
   0x1   :  { %9 = vsyncpa [#allocation6], 0 }
   0x2   :  { %10 = vsyncpa [#allocation4], 0  ;;  %s264_s12 = smov [#allocation2]   ;;  %s192_s16 = scalar_lea.hbm %s337_s0, 256 }
   0x3   :  { %s16_s13 = sshll.u32 %s264_s12, 4  ;;  %p193_p0 = scmp.ne.s32.totalorder %s337_s0, %s192_s16  ;;  %s17_s13 = int_to_ptr.vmem [resolvable:$true] %s16_s13 }
   0x4   :  { %p196_p1 = scmp.lt.u32.totalorder %s192_s16, %s337_s0 }
   0x6   :  { %p198_p2 = pnand %p196_p1, %p193_p0 }
   0x8   :  { %201 = shalt.err (!%p198_p2)
}
   0x9   :  { %s202_s21 = scalar_lea.vmem %s17_s13, 256  ;;  %p207_p4 = scmp.lt.s32.totalorder %s17_s13, %s17_s13 }
   0xa   :  { %p203_p3 = scmp.ne.s32.totalorder %s17_s13, %s202_s21  ;;  %p208_p5 = scmp.lt.s32.totalorder %s202_s21, %s202_s21 }
   0xc   :  { %p209_p6 = por %p208_p5, %p207_p4 }
   0xe   :  { %p210_p7 = pnand %p209_p6, %p203_p3 }
  0x10   :  { %213 = shalt.err (!%p210_p7)
}
  0x11   :  { %s265_s22 = smov 128   ;;  %s266_s23 = smov 8  }
  0x12   :  { %22 = dma.hbm_to_vmem [thread:$0]  %s337_s0, 256, %s17_s13, [#allocation3], %s265_s22, %s265_s22, %s266_s23  }
  0x13   :  { %s267_s26 = smov [#allocation5]   ;;  %s214_s30 = scalar_lea.hbm %s338_s1, 512 }
  0x14   :  { %s28_s27 = sshll.u32 %s267_s26, 4  ;;  %p215_p8 = scmp.ne.s32.totalorder %s338_s1, %s214_s30  ;;  %s29_s27 = int_to_ptr.vmem [resolvable:$true] %s28_s27 }
  0x15   :  { %p218_p9 = scmp.lt.u32.totalorder %s214_s30, %s338_s1 }
  0x17   :  { %p220_p10 = pnand %p218_p9, %p215_p8 }
  0x19   :  { %223 = shalt.err (!%p220_p10)
}
  0x1a   :  { %s224_s8 = scalar_lea.vmem %s29_s27, 512  ;;  %p229_p12 = scmp.lt.s32.totalorder %s29_s27, %s29_s27 }
  0x1b   :  { %p225_p11 = scmp.ne.s32.totalorder %s29_s27, %s224_s8  ;;  %p230_p13 = scmp.lt.s32.totalorder %s224_s8, %s224_s8 }
  0x1d   :  { %p231_p0 = por %p230_p13, %p229_p12 }
  0x1f   :  { %p232_p1 = pnand %p231_p0, %p225_p11 }
  0x21   :  { %235 = shalt.err (!%p232_p1)
}
  0x22   :  { %34 = dma.hbm_to_vmem [thread:$0]  %s338_s1, 512, %s29_s27, [#allocation6], %s265_s22, %s265_s22, %s266_s23  }
  0x23   :  { %258 = dma.done.wait [#allocation3], 256  }
  0x24   :  { %259 = vsyncadd [#allocation3], 4294967040 }
  0x25   :  { %260 = dma.done.wait [#allocation6], 512  }
  0x26   :  { %261 = vsyncadd [#allocation6], 4294966784  ;;  %vm56_vm0 = vcmask 261120   ;;  %v45_v0 = vld [vmem:[#allocation5] sm:$0xff]  ;;  %v46_v1 = vld [vmem:[#allocation5 + $0x8] sm:$0xff]  ;;  %s268_s11 = smov [#allocation7]  }
  0x27   :  { %v47_v2 = vld [vmem:[#allocation5 + $0x10] sm:$0xff]  ;;  %v179_v3 = vpack.c.bf16 %v46_v1, %v45_v0  ;;  %v48_v4 = vld [vmem:[#allocation5 + $0x18] sm:$0xff]  ;;  %s146_s12 = sshll.u32 %s268_s11, 4  ;;  %vm138_vm1 = vcmask 785408   ;;  %s147_s12 = int_to_ptr.vmem [resolvable:$true] %s146_s12 }
  0x28   :  { %v43_v5 = vld [vmem:[#allocation2] sm:$0xff]  ;;  %v183_v6 = vpack.c.bf16 %v48_v4, %v47_v2  ;;  %v44_v7 = vld [vmem:[#allocation2 + $0x8] sm:$0xff]  ;;  %s236_s13 = scalar_lea.vmem %s147_s12, 256  ;;  %p241_p3 = scmp.lt.s32.totalorder %s147_s12, %s147_s12 }
  0x29   :  { %176 = vmatprep.mubr.msk.f32.mxu0 %vm56_vm0, %v43_v5  ;;  %180 = vmatprep.subr.bf16.mxu0 %v179_v3  ;;  %v159_v8 = vld [vmem:[%s339_s2] ss:$0 sm:$0xff]  ;;  %p237_p2 = scmp.ne.s32.totalorder %s147_s12, %s236_s13  ;;  %p242_p4 = scmp.lt.s32.totalorder %s236_s13, %s236_s13 }
  0x2a   :  { %182 = vmatpush3.bf16.msra.mxu0 %v179_v3 }
  0x2b   :  { %184 = vmatprep.subr.bf16.mxu0 %v183_v6  ;;  %p243_p5 = por %p242_p4, %p241_p3 }
  0x2d   :  { %p244_p6 = pnand %p243_p5, %p237_p2 }
  0x2e   :  { %186 = vmatpush3.bf16.msra.mxu0 %v183_v6 }
  0x31   :  { %177 = vmatmul.mubr.msk.f32.vlgmr.msra.gmra.mrb[0].mxu0 %vm56_vm0, %v44_v7 }
 0x104   :  { %v178_v9 = vpop.f32.mrb[0].mxu0 }
 0x105   :  { %v135_v10 = vadd.f32 %v178_v9, %v159_v8  ;;  %v129_v11 = vpop.f32.mrb[1].mxu0 }
 0x106   :  { %v130_v12 = vadd.f32 %v159_v8, %v129_v11 }
 0x107   :  { %140 = vst.msk [vmem:[#allocation7 + $0x8] sm:$0xff] %vm138_vm1, %v135_v10 }
 0x108   :  { %139 = vst.msk [vmem:[#allocation7] sm:$0xff] %vm138_vm1, %v130_v12 }
 0x109   :  { %247 = shalt.err (!%p244_p6)
}
 0x10a   :  { %s248_s2 = scalar_lea.hbm %s340_s3, 256 }
 0x10b   :  { %p249_p7 = scmp.ne.s32.totalorder %s340_s3, %s248_s2  ;;  %p252_p8 = scmp.lt.u32.totalorder %s248_s2, %s340_s3 }
 0x10d   :  { %p254_p9 = pnand %p252_p8, %p249_p7 }
 0x10f   :  { %257 = shalt.err (!%p254_p9)
}
 0x110   :  { %152 = dma.vmem_to_hbm [thread:$0]  %s147_s12, 256, %s340_s3, [#allocation4], %s265_s22, %s265_s22, %s266_s23  }
 0x111   :  { %262 = dma.done.wait [#allocation4], 256  }
 0x112   :  { %263 = vsyncadd [#allocation4], 4294967040 }
 0x113   :  { %156 = vsyncpa [#allocation3], 1 }
 0x114   :  { %157 = vsyncpa [#allocation6], 1 }
 0x115   :  { %158 = vsyncpa [#allocation4], 1 }

</bundles_post_ra>
